<compile_context>
chip_gen: v7x
topology: tpu7x:2x2x1
jax: 0.10.0
libtpu: 0.0.40
codegen_flags: <defaults>
</compile_context>

<pallas_src>
import functools

import jax
import jax.numpy as jnp
from jax.experimental import pallas as pl
from jax.experimental.pallas import tpu as pltpu


def rnn_recurrence_kernel(xw_ref, whh_ref, wfc_ref, bfc_ref, out_ref, h_ref,
                          *, t_chunk, t_total):
    """One time-chunk of the serial RNN recurrence + fused FC head.

    xw_ref:  (Tt, B, Hp)  streamed chunk of x_t @ W_ih^T + (b_ih + b_hh)
    whh_ref: (Hp, Hp)     W_hh^T, zero-padded (resident; constant block index)
    wfc_ref: (Hp, Op)     W_fc^T, zero-padded (resident)
    bfc_ref: (1, Op)      b_fc,   zero-padded (resident)
    out_ref: (B, Op)      lane-dense output, column 0..O-1 = FC result
    h_ref:   (B, Hp)      VMEM scratch carrying h across grid steps
    """
    i = pl.program_id(0)

    @pl.when(i == 0)
    def _():
        h_ref[...] = jnp.zeros_like(h_ref)

    whh = whh_ref[...]                       # resident recurrent weight tile
    base = i * t_chunk
    tail_masked = (t_total % t_chunk) != 0   # static Python bool

    def step(t, h):
        pre = xw_ref[t] + jnp.dot(h, whh, preferred_element_type=jnp.float32)
        h_new = jnp.tanh(pre)
        if tail_masked:
            # Padded tail steps (base + t >= t_total) must leave h unchanged.
            h_new = jnp.where(base + t < t_total, h_new, h)
        return h_new

    h = jax.lax.fori_loop(0, t_chunk, step, h_ref[...],
                          unroll=min(t_chunk, 8))
    h_ref[...] = h

    @pl.when(i == pl.num_programs(0) - 1)
    def _():
        # Fused FC head: one MXU matmul on the final hidden state, lane-dense store.
        out_ref[...] = (
            jnp.dot(h, wfc_ref[...], preferred_element_type=jnp.float32)
            + bfc_ref[...]
        )


def rnn_forward(x, w_ih, w_hh, b_ih, b_hh, w_fc, b_fc, *, t_chunk=128):
    """x: (B, T, I), batch_first like PyTorch.  Returns (B, output_size)."""
    B, T, I = x.shape
    H = w_ih.shape[0]
    O = w_fc.shape[0]
    Hp = pl.cdiv(H, 128) * 128          # hidden dim padded to lane width
    Op = pl.cdiv(O, 128) * 128          # FC output padded to lane width
    f32 = jnp.float32

    # VMEM budget for the streamed, double-buffered XW chunk: keep
    # 2 * Tt * B * Hp * 4 bytes under an ~8 MiB cap so the kernel fits the
    # smallest default scoped VMEM (v5e: 16 MiB) with headroom on v7x (64 MiB
    # physical / 32 MiB scoped).
    budget_rows = max(1, (8 << 20) // (2 * B * Hp * 4))
    t_chunk = max(1, min(t_chunk, T, budget_rows))
    n_chunks = pl.cdiv(T, t_chunk)
    t_pad = n_chunks * t_chunk

    x = x.astype(f32)

    # Pad the input-projection weight / bias up-front so the single fused
    # einsum emits XW directly in time-major, lane-dense (T, B, Hp) layout
    # (batch_first -> time-major transpose folded into the contraction; no
    # post-hoc pad of the largest tensor).
    w_ih_p = jnp.zeros((Hp, I), f32).at[:H, :].set(w_ih.astype(f32))
    bias_p = jnp.zeros((Hp,), f32).at[:H].set((b_ih + b_hh).astype(f32))
    xw = jnp.einsum("bti,hi->tbh", x, w_ih_p, preferred_element_type=f32) + bias_p
    if t_pad != T:
        xw = jnp.pad(xw, ((0, t_pad - T), (0, 0), (0, 0)))   # tail chunk only

    # Lane-dense, zero-padded weight tiles (padding is numerically exact).
    whh_p = jnp.zeros((Hp, Hp), f32).at[:H, :H].set(jnp.transpose(w_hh).astype(f32))
    wfc_p = jnp.zeros((Hp, Op), f32).at[:H, :O].set(jnp.transpose(w_fc).astype(f32))
    bfc_p = jnp.zeros((1, Op), f32).at[0, :O].set(b_fc.astype(f32))

    kernel = functools.partial(rnn_recurrence_kernel, t_chunk=t_chunk, t_total=T)

    out = pl.pallas_call(
        kernel,
        out_shape=jax.ShapeDtypeStruct((B, Op), f32),
        grid_spec=pltpu.PrefetchScalarGridSpec(
            num_scalar_prefetch=0,
            grid=(n_chunks,),
            in_specs=[
                pl.BlockSpec((t_chunk, B, Hp), lambda i: (i, 0, 0)),  # streamed XW
                pl.BlockSpec((Hp, Hp), lambda i: (0, 0)),             # W_hh^T (resident)
                pl.BlockSpec((Hp, Op), lambda i: (0, 0)),             # W_fc^T (resident)
                pl.BlockSpec((1, Op), lambda i: (0, 0)),              # b_fc   (resident)
            ],
            out_specs=pl.BlockSpec((B, Op), lambda i: (0, 0)),
            scratch_shapes=[pltpu.VMEM((B, Hp), f32)],                # carried h
        ),
        compiler_params=pltpu.CompilerParams(
            dimension_semantics=("arbitrary",),   # time axis is strictly serial
        ),
    )(xw, whh_p, wfc_p, bfc_p)

    return out[:, :O]


def rnn_reference(x, w_ih, w_hh, b_ih, b_hh, w_fc, b_fc):
    """Pure-JAX reference matching torch nn.RNN(tanh) + Linear."""
    B = x.shape[0]
    H = w_ih.shape[0]
    h = jnp.zeros((B, H), jnp.float32)

    def step(h, x_t):
        h_new = jnp.tanh(x_t @ w_ih.T + b_ih + h @ w_hh.T + b_hh)
        return h_new, None

    h_last, _ = jax.lax.scan(step, h, jnp.transpose(x, (1, 0, 2)))
    return h_last @ w_fc.T + b_fc


if __name__ == "__main__":
    # Module hyperparameters (defaults from RNNModel.__init__)
    input_size = 1
    hidden_size = 50
    num_layers = 1
    output_size = 1

    # Small example input consistent with the forward: (batch, seq, input_size)
    B, T = 2, 8

    key = jax.random.PRNGKey(0)
    kx, k1, k2, k3, k4, k5, k6 = jax.random.split(key, 7)

    x = jax.random.normal(kx, (B, T, input_size), jnp.float32)

    # Deterministic parameter init (uniform in [-1/sqrt(H), 1/sqrt(H)], like torch).
    bound = 1.0 / jnp.sqrt(jnp.float32(hidden_size))
    w_ih = jax.random.uniform(k1, (hidden_size, input_size), jnp.float32, -bound, bound)
    w_hh = jax.random.uniform(k2, (hidden_size, hidden_size), jnp.float32, -bound, bound)
    b_ih = jax.random.uniform(k3, (hidden_size,), jnp.float32, -bound, bound)
    b_hh = jax.random.uniform(k4, (hidden_size,), jnp.float32, -bound, bound)
    w_fc = jax.random.uniform(k5, (output_size, hidden_size), jnp.float32, -bound, bound)
    b_fc = jax.random.uniform(k6, (output_size,), jnp.float32, -bound, bound)

    out = rnn_forward(x, w_ih, w_hh, b_ih, b_hh, w_fc, b_fc)
    out = jax.block_until_ready(out)

    ref = rnn_reference(x, w_ih, w_hh, b_ih, b_hh, w_fc, b_fc)
    assert out.shape == (B, output_size), out.shape
    # Tolerance accounts for f32 matmuls possibly lowering to bf16 multi-pass
    # MXU passes inside the kernel with rounding that differs from the XLA
    # reference; real bugs (wrong transpose / bias / recurrence) give O(0.1) errors.
    assert jnp.allclose(out, ref, atol=2e-3, rtol=2e-3), (out, ref)

    print("KERNEL_OK")
</pallas_src>

<mosaic_0001>
module attributes {stable_mosaic.version = 11 : i64} {
  func.func @rnn_recurrence_kernel(%arg0: i32, %arg1: memref<8x2x128xf32, #tpu.memory_space<vmem>>, %arg2: memref<128x128xf32, #tpu.memory_space<vmem>>, %arg3: memref<128x128xf32, #tpu.memory_space<vmem>>, %arg4: memref<1x128xf32, #tpu.memory_space<vmem>>, %arg5: memref<2x128xf32, #tpu.memory_space<vmem>>, %arg6: memref<2x128xf32, #tpu.memory_space<vmem>>) attributes {dimension_semantics = [#tpu.dimension_semantics<arbitrary>], iteration_bounds = array<i64: 1>, scalar_prefetch = 0 : i64, scratch_operands = 1 : i64, tpu.core_type = #tpu.core_type<tc>, window_params = [{transform_indices = @transform_0, window_bounds = array<i64: 8, 2, 128>}, {pipeline_mode = #tpu.pipeline_mode<synchronous>, transform_indices = @transform_1, window_bounds = array<i64: 128, 128>}, {pipeline_mode = #tpu.pipeline_mode<synchronous>, transform_indices = @transform_2, window_bounds = array<i64: 128, 128>}, {pipeline_mode = #tpu.pipeline_mode<synchronous>, transform_indices = @transform_3, window_bounds = array<i64: 1, 128>}, {pipeline_mode = #tpu.pipeline_mode<synchronous>, transform_indices = @transform_4, window_bounds = array<i64: 2, 128>}]} {
    %c0_i32 = arith.constant 0 : i32
    %0 = arith.cmpi eq, %arg0, %c0_i32 : i32
    %1 = arith.extui %0 : i1 to i32
    %c0_i32_0 = arith.constant 0 : i32
    %2 = arith.cmpi ne, %1, %c0_i32_0 : i32
    scf.if %2 {
      %cst_32 = arith.constant 0.000000e+00 : f32
      %57 = vector.broadcast %cst_32 : f32 to vector<2x128xf32>
      %c0_33 = arith.constant 0 : index
      %c0_34 = arith.constant 0 : index
      %58 = vector.load %arg6[%c0_33, %c0_34] : memref<2x128xf32, #tpu.memory_space<vmem>>, vector<2x128xf32>
      tpu.vector_store %arg6[%c0_33, %c0_34], %57 {strides = array<i32>} : memref<2x128xf32, #tpu.memory_space<vmem>>, vector<2x128xf32>,
    } else {
    }
    %c0 = arith.constant 0 : index
    %c0_1 = arith.constant 0 : index
    %3 = vector.load %arg2[%c0, %c0_1] : memref<128x128xf32, #tpu.memory_space<vmem>>, vector<128x128xf32>
    %c0_2 = arith.constant 0 : index
    %c0_3 = arith.constant 0 : index
    %4 = vector.load %arg6[%c0_2, %c0_3] : memref<2x128xf32, #tpu.memory_space<vmem>>, vector<2x128xf32>
    %c0_i32_4 = arith.constant 0 : i32
    %5 = arith.index_cast %c0_i32_4 : i32 to index
    %c0_5 = arith.constant 0 : index
    %c0_6 = arith.constant 0 : index
    %6 = vector.load %arg1[%5, %c0_5, %c0_6] : memref<8x2x128xf32, #tpu.memory_space<vmem>>, vector<1x2x128xf32>
    %7 = vector.shape_cast %6 : vector<1x2x128xf32> to vector<2x128xf32>
    %cst = arith.constant dense<0.000000e+00> : vector<2x128xf32>
    %8 = tpu.matmul %4, %3, %cst {dimension_numbers = #tpu.dot_dimension_numbers<[1], [0], [0], [1], [0, 0, 1, 1], [], []>} : vector<2x128xf32>, vector<128x128xf32>, vector<2x128xf32> -> vector<2x128xf32>
    %9 = arith.addf %7, %8 : vector<2x128xf32>
    %10 = math.tanh %9 : vector<2x128xf32>
    %c1_i32 = arith.constant 1 : i32
    %11 = arith.index_cast %c1_i32 : i32 to index
    %c0_7 = arith.constant 0 : index
    %c0_8 = arith.constant 0 : index
    %12 = vector.load %arg1[%11, %c0_7, %c0_8] : memref<8x2x128xf32, #tpu.memory_space<vmem>>, vector<1x2x128xf32>
    %13 = vector.shape_cast %12 : vector<1x2x128xf32> to vector<2x128xf32>
    %cst_9 = arith.constant dense<0.000000e+00> : vector<2x128xf32>
    %14 = tpu.matmul %10, %3, %cst_9 {dimension_numbers = #tpu.dot_dimension_numbers<[1], [0], [0], [1], [0, 0, 1, 1], [], []>} : vector<2x128xf32>, vector<128x128xf32>, vector<2x128xf32> -> vector<2x128xf32>
    %15 = arith.addf %13, %14 : vector<2x128xf32>
    %16 = math.tanh %15 : vector<2x128xf32>
    %c2_i32 = arith.constant 2 : i32
    %17 = arith.index_cast %c2_i32 : i32 to index
    %c0_10 = arith.constant 0 : index
    %c0_11 = arith.constant 0 : index
    %18 = vector.load %arg1[%17, %c0_10, %c0_11] : memref<8x2x128xf32, #tpu.memory_space<vmem>>, vector<1x2x128xf32>
    %19 = vector.shape_cast %18 : vector<1x2x128xf32> to vector<2x128xf32>
    %cst_12 = arith.constant dense<0.000000e+00> : vector<2x128xf32>
    %20 = tpu.matmul %16, %3, %cst_12 {dimension_numbers = #tpu.dot_dimension_numbers<[1], [0], [0], [1], [0, 0, 1, 1], [], []>} : vector<2x128xf32>, vector<128x128xf32>, vector<2x128xf32> -> vector<2x128xf32>
    %21 = arith.addf %19, %20 : vector<2x128xf32>
    %22 = math.tanh %21 : vector<2x128xf32>
    %c3_i32 = arith.constant 3 : i32
    %23 = arith.index_cast %c3_i32 : i32 to index
    %c0_13 = arith.constant 0 : index
    %c0_14 = arith.constant 0 : index
    %24 = vector.load %arg1[%23, %c0_13, %c0_14] : memref<8x2x128xf32, #tpu.memory_space<vmem>>, vector<1x2x128xf32>
    %25 = vector.shape_cast %24 : vector<1x2x128xf32> to vector<2x128xf32>
    %cst_15 = arith.constant dense<0.000000e+00> : vector<2x128xf32>
    %26 = tpu.matmul %22, %3, %cst_15 {dimension_numbers = #tpu.dot_dimension_numbers<[1], [0], [0], [1], [0, 0, 1, 1], [], []>} : vector<2x128xf32>, vector<128x128xf32>, vector<2x128xf32> -> vector<2x128xf32>
    %27 = arith.addf %25, %26 : vector<2x128xf32>
    %28 = math.tanh %27 : vector<2x128xf32>
    %c4_i32 = arith.constant 4 : i32
    %29 = arith.index_cast %c4_i32 : i32 to index
    %c0_16 = arith.constant 0 : index
    %c0_17 = arith.constant 0 : index
    %30 = vector.load %arg1[%29, %c0_16, %c0_17] : memref<8x2x128xf32, #tpu.memory_space<vmem>>, vector<1x2x128xf32>
    %31 = vector.shape_cast %30 : vector<1x2x128xf32> to vector<2x128xf32>
    %cst_18 = arith.constant dense<0.000000e+00> : vector<2x128xf32>
    %32 = tpu.matmul %28, %3, %cst_18 {dimension_numbers = #tpu.dot_dimension_numbers<[1], [0], [0], [1], [0, 0, 1, 1], [], []>} : vector<2x128xf32>, vector<128x128xf32>, vector<2x128xf32> -> vector<2x128xf32>
    %33 = arith.addf %31, %32 : vector<2x128xf32>
    %34 = math.tanh %33 : vector<2x128xf32>
    %c5_i32 = arith.constant 5 : i32
    %35 = arith.index_cast %c5_i32 : i32 to index
    %c0_19 = arith.constant 0 : index
    %c0_20 = arith.constant 0 : index
    %36 = vector.load %arg1[%35, %c0_19, %c0_20] : memref<8x2x128xf32, #tpu.memory_space<vmem>>, vector<1x2x128xf32>
    %37 = vector.shape_cast %36 : vector<1x2x128xf32> to vector<2x128xf32>
    %cst_21 = arith.constant dense<0.000000e+00> : vector<2x128xf32>
    %38 = tpu.matmul %34, %3, %cst_21 {dimension_numbers = #tpu.dot_dimension_numbers<[1], [0], [0], [1], [0, 0, 1, 1], [], []>} : vector<2x128xf32>, vector<128x128xf32>, vector<2x128xf32> -> vector<2x128xf32>
    %39 = arith.addf %37, %38 : vector<2x128xf32>
    %40 = math.tanh %39 : vector<2x128xf32>
    %c6_i32 = arith.constant 6 : i32
    %41 = arith.index_cast %c6_i32 : i32 to index
    %c0_22 = arith.constant 0 : index
    %c0_23 = arith.constant 0 : index
    %42 = vector.load %arg1[%41, %c0_22, %c0_23] : memref<8x2x128xf32, #tpu.memory_space<vmem>>, vector<1x2x128xf32>
    %43 = vector.shape_cast %42 : vector<1x2x128xf32> to vector<2x128xf32>
    %cst_24 = arith.constant dense<0.000000e+00> : vector<2x128xf32>
    %44 = tpu.matmul %40, %3, %cst_24 {dimension_numbers = #tpu.dot_dimension_numbers<[1], [0], [0], [1], [0, 0, 1, 1], [], []>} : vector<2x128xf32>, vector<128x128xf32>, vector<2x128xf32> -> vector<2x128xf32>
    %45 = arith.addf %43, %44 : vector<2x128xf32>
    %46 = math.tanh %45 : vector<2x128xf32>
    %c7_i32 = arith.constant 7 : i32
    %47 = arith.index_cast %c7_i32 : i32 to index
    %c0_25 = arith.constant 0 : index
    %c0_26 = arith.constant 0 : index
    %48 = vector.load %arg1[%47, %c0_25, %c0_26] : memref<8x2x128xf32, #tpu.memory_space<vmem>>, vector<1x2x128xf32>
    %49 = vector.shape_cast %48 : vector<1x2x128xf32> to vector<2x128xf32>
    %cst_27 = arith.constant dense<0.000000e+00> : vector<2x128xf32>
    %50 = tpu.matmul %46, %3, %cst_27 {dimension_numbers = #tpu.dot_dimension_numbers<[1], [0], [0], [1], [0, 0, 1, 1], [], []>} : vector<2x128xf32>, vector<128x128xf32>, vector<2x128xf32> -> vector<2x128xf32>
    %51 = arith.addf %49, %50 : vector<2x128xf32>
    %52 = math.tanh %51 : vector<2x128xf32>
    %c8_i32 = arith.constant 8 : i32
    %c0_28 = arith.constant 0 : index
    %c0_29 = arith.constant 0 : index
    %53 = vector.load %arg6[%c0_28, %c0_29] : memref<2x128xf32, #tpu.memory_space<vmem>>, vector<2x128xf32>
    tpu.vector_store %arg6[%c0_28, %c0_29], %52 {strides = array<i32>} : memref<2x128xf32, #tpu.memory_space<vmem>>, vector<2x128xf32>,
    %c0_i32_30 = arith.constant 0 : i32
    %54 = arith.cmpi eq, %arg0, %c0_i32_30 : i32
    %55 = arith.extui %54 : i1 to i32
    %c0_i32_31 = arith.constant 0 : i32
    %56 = arith.cmpi ne, %55, %c0_i32_31 : i32
    scf.if %56 {
      %c0_32 = arith.constant 0 : index
      %c0_33 = arith.constant 0 : index
      %57 = vector.load %arg3[%c0_32, %c0_33] : memref<128x128xf32, #tpu.memory_space<vmem>>, vector<128x128xf32>
      %cst_34 = arith.constant dense<0.000000e+00> : vector<2x128xf32>
      %58 = tpu.matmul %52, %57, %cst_34 {dimension_numbers = #tpu.dot_dimension_numbers<[1], [0], [0], [1], [0, 0, 1, 1], [], []>} : vector<2x128xf32>, vector<128x128xf32>, vector<2x128xf32> -> vector<2x128xf32>
      %c0_35 = arith.constant 0 : index
      %c0_36 = arith.constant 0 : index
      %59 = vector.load %arg4[%c0_35, %c0_36] : memref<1x128xf32, #tpu.memory_space<vmem>>, vector<1x128xf32>
      %60 = vector.broadcast %59 : vector<1x128xf32> to vector<2x128xf32>
      %61 = arith.addf %58, %60 : vector<2x128xf32>
      %c0_37 = arith.constant 0 : index
      %c0_38 = arith.constant 0 : index
      %62 = vector.load %arg5[%c0_37, %c0_38] : memref<2x128xf32, #tpu.memory_space<vmem>>, vector<2x128xf32>
      tpu.vector_store %arg5[%c0_37, %c0_38], %61 {strides = array<i32>} : memref<2x128xf32, #tpu.memory_space<vmem>>, vector<2x128xf32>,
    } else {
    }
    return
  }
  func.func @transform_0(%arg0: i32) -> (i32, i32, i32) {
    %c0_i32 = arith.constant 0 : i32
    %c0_i32_0 = arith.constant 0 : i32
    %c0_i32_1 = arith.constant 0 : i32
    return %arg0, %c0_i32, %c0_i32_0 : i32, i32, i32
  }
  func.func @transform_1(%arg0: i32) -> (i32, i32) {
    %c0_i32 = arith.constant 0 : i32
    %c0_i32_0 = arith.constant 0 : i32
    %c0_i32_1 = arith.constant 0 : i32
    return %c0_i32, %c0_i32_0 : i32, i32
  }
  func.func @transform_2(%arg0: i32) -> (i32, i32) {
    %c0_i32 = arith.constant 0 : i32
    %c0_i32_0 = arith.constant 0 : i32
    %c0_i32_1 = arith.constant 0 : i32
    return %c0_i32, %c0_i32_0 : i32, i32
  }
  func.func @transform_3(%arg0: i32) -> (i32, i32) {
    %c0_i32 = arith.constant 0 : i32
    %c0_i32_0 = arith.constant 0 : i32
    %c0_i32_1 = arith.constant 0 : i32
    return %c0_i32, %c0_i32_0 : i32, i32
  }
  func.func @transform_4(%arg0: i32) -> (i32, i32) {
    %c0_i32 = arith.constant 0 : i32
    %c0_i32_0 = arith.constant 0 : i32
    %c0_i32_1 = arith.constant 0 : i32
    return %c0_i32, %c0_i32_0 : i32, i32
  }
}

</mosaic_0001>

<bundles_post_ra>
// kernel: tpu_custom_call.1
= control target key start
LH: loop header
LB: loop body
LE: loop exit
PB: predicated region body
PF: predicated region fallthrough
CT: control target
= control target key end

     0   :  { %9 = vsyncpa [#allocation4], 0  ;;  %s1856_s0 = inlined_call_operand.hbm [shape: f32[8,2,128], index: 0, kind: input, shape index: {}]   ;;  %s1857_s1 = inlined_call_operand.hbm [shape: f32[128,128], index: 1, kind: input, shape index: {}]   ;;  %s1858_s2 = inlined_call_operand.hbm [shape: f32[128,128], index: 2, kind: input, shape index: {}]   ;;  %s1859_s3 = inlined_call_operand.vmem [shape: f32[1,128], index: 3, kind: input, shape index: {}]   ;;  %s1860_s4 = inlined_call_operand.hbm [shape: f32[2,128], index: 4, kind: output, shape index: {}]  }
   0x1   :  { %10 = vsyncpa [#allocation7], 0 }
   0x2   :  { %11 = vsyncpa [#allocation5], 0  ;;  %s1592_s15 = smov [#allocation6]   ;;  %s1498_s19 = scalar_lea.hbm %s1857_s1, 2048 }
   0x3   :  { %s29_s16 = sshll.u32 %s1592_s15, 4  ;;  %p1499_p0 = scmp.ne.s32.totalorder %s1857_s1, %s1498_s19  ;;  %s30_s16 = int_to_ptr.vmem [resolvable:$true] %s29_s16 }
   0x4   :  { %p1502_p1 = scmp.lt.u32.totalorder %s1498_s19, %s1857_s1 }
   0x6   :  { %p1504_p2 = pnand %p1502_p1, %p1499_p0 }
   0x8   :  { %1507 = shalt.err (!%p1504_p2)
}
   0x9   :  { %s1508_s24 = scalar_lea.vmem %s30_s16, 2048  ;;  %p1513_p4 = scmp.lt.s32.totalorder %s30_s16, %s30_s16 }
   0xa   :  { %p1509_p3 = scmp.ne.s32.totalorder %s30_s16, %s1508_s24  ;;  %p1514_p5 = scmp.lt.s32.totalorder %s1508_s24, %s1508_s24 }
   0xc   :  { %p1515_p6 = por %p1514_p5, %p1513_p4 }
   0xe   :  { %p1516_p7 = pnand %p1515_p6, %p1509_p3 }
  0x10   :  { %1519 = shalt.err (!%p1516_p7)
}
  0x11   :  { %s1593_s25 = smov 128   ;;  %s1594_s26 = smov 8  }
  0x12   :  { %35 = dma.hbm_to_vmem [thread:$0]  %s1857_s1, 2048, %s30_s16, [#allocation7], %s1593_s25, %s1593_s25, %s1594_s26  }
  0x13   :  { %s1595_s29 = smov [#allocation3]   ;;  %s1520_s7 = scalar_lea.hbm %s1856_s0, 256 }
  0x14   :  { %s17_s30 = sshll.u32 %s1595_s29, 4  ;;  %p1521_p8 = scmp.ne.s32.totalorder %s1856_s0, %s1520_s7  ;;  %s18_s30 = int_to_ptr.vmem [resolvable:$true] %s17_s30 }
  0x15   :  { %p1524_p9 = scmp.lt.u32.totalorder %s1520_s7, %s1856_s0 }
  0x17   :  { %p1526_p10 = pnand %p1524_p9, %p1521_p8 }
  0x19   :  { %1529 = shalt.err (!%p1526_p10)
}
  0x1a   :  { %s1530_s12 = scalar_lea.vmem %s18_s30, 256  ;;  %p1535_p12 = scmp.lt.s32.totalorder %s18_s30, %s18_s30 }
  0x1b   :  { %p1531_p11 = scmp.ne.s32.totalorder %s18_s30, %s1530_s12  ;;  %p1536_p13 = scmp.lt.s32.totalorder %s1530_s12, %s1530_s12 }
  0x1d   :  { %p1537_p0 = por %p1536_p13, %p1535_p12 }
  0x1f   :  { %p1538_p1 = pnand %p1537_p0, %p1531_p11 }
  0x21   :  { %1541 = shalt.err (!%p1538_p1)
}
  0x22   :  { %s1596_s1 = smov 32   ;;  %s1597_s13 = smov 2  }
  0x23   :  { %23 = dma.hbm_to_vmem [thread:$0]  %s1856_s0, 256, %s18_s30, [#allocation4], %s1596_s1, %s1596_s1, %s1597_s13  }
  0x24   :  { %s1598_s16 = smov [#allocation8]   ;;  %s1542_s20 = scalar_lea.hbm %s1858_s2, 2048 }
  0x25   :  { %s41_s17 = sshll.u32 %s1598_s16, 4  ;;  %p1543_p2 = scmp.ne.s32.totalorder %s1858_s2, %s1542_s20  ;;  %s42_s17 = int_to_ptr.vmem [resolvable:$true] %s41_s17 }
  0x26   :  { %p1546_p3 = scmp.lt.u32.totalorder %s1542_s20, %s1858_s2 }
  0x28   :  { %p1548_p4 = pnand %p1546_p3, %p1543_p2 }
  0x2a   :  { %1551 = shalt.err (!%p1548_p4)
}
  0x2b   :  { %s1552_s27 = scalar_lea.vmem %s42_s17, 2048  ;;  %p1557_p6 = scmp.lt.s32.totalorder %s42_s17, %s42_s17 }
  0x2c   :  { %p1553_p5 = scmp.ne.s32.totalorder %s42_s17, %s1552_s27  ;;  %p1558_p7 = scmp.lt.s32.totalorder %s1552_s27, %s1552_s27 }
  0x2e   :  { %p1559_p8 = por %p1558_p7, %p1557_p6 }
  0x30   :  { %p1560_p9 = pnand %p1559_p8, %p1553_p5 }
  0x32   :  { %1563 = shalt.err (!%p1560_p9)
}
  0x33   :  { %47 = dma.hbm_to_vmem [thread:$0]  %s1858_s2, 2048, %s42_s17, [#allocation7], %s1593_s25, %s1593_s25, %s1594_s26  }
  0x34   :  { %1586 = dma.done.wait [#allocation4], 256  }
  0x35   :  { %1587 = vsyncadd [#allocation4], 4294967040 }
  0x36   :  { %1588 = dma.done.wait [#allocation7], 4096  }
  0x37   :  { %1589 = vsyncadd [#allocation7], 4294963200  ;;  %v1599_v0 = vmov 0.0|0.0   ;;  %vm1600_vm0 = vmmov 0   ;;  %v1601_v1 = vmov 0.0   ;;  %v64_v2 = vld [vmem:[#allocation6] sm:$0xff] }
  0x38   :  { %1255 = vmatprep.subr.bf16.mxu0 %v1599_v0  ;;  %972 = vmatprep.mubr.msk.f32.mxu0 %vm1600_vm0, %v1601_v1  ;;  %63 = vst [vmem:[#allocation2] sm:$0x3] %v1601_v1  ;;  %v65_v3 = vld [vmem:[#allocation6 + $0x8] sm:$0xff]  ;;  %v66_v4 = vld [vmem:[#allocation6 + $0x10] sm:$0xff]  ;;  %v67_v6 = vld [vmem:[#allocation6 + $0x18] sm:$0xff]  ;;  %s1602_s26 = smov [#allocation9]  }
  0x39   :  { %1279 = vmatprep.subr.bf16.mxu1 %v1599_v0  ;;  %1007 = vmatprep.mubr.msk.f32.mxu1 %vm1600_vm0, %v1601_v1  ;;  %v1677_v5 = vpack.c.bf16 %v65_v3, %v64_v2  ;;  %v1680_v7 = vpack.c.bf16 %v67_v6, %v66_v4  ;;  %v68_v8 = vld [vmem:[#allocation6 + $0x20] sm:$0xff]  ;;  %v69_v9 = vld [vmem:[#allocation6 + $0x28] sm:$0xff]  ;;  %v70_v11 = vld [vmem:[#allocation6 + $0x30] sm:$0xff]  ;;  %s776_s29 = sshll.u32 %s1602_s26, 4  ;;  %s777_s29 = int_to_ptr.vmem [resolvable:$true] %s776_s29 }
  0x3a   :  { %v1686_v10 = vpack.c.bf16 %v69_v9, %v68_v8  ;;  %v71_v12 = vld [vmem:[#allocation6 + $0x38] sm:$0xff]  ;;  %v72_v14 = vld [vmem:[#allocation6 + $0x40] sm:$0xff]  ;;  %v73_v15 = vld [vmem:[#allocation6 + $0x48] sm:$0xff]  ;;  %s1564_s30 = scalar_lea.vmem %s777_s29, 32  ;;  %p1569_p11 = scmp.lt.s32.totalorder %s777_s29, %s777_s29 }
  0x3b   :  { %1257 = vmatpush3.bf16.msra.mxu0 %v1677_v5  ;;  %1281 = vmatpush3.bf16.msra.mxu1 %v1677_v5  ;;  %v1692_v13 = vpack.c.bf16 %v71_v12, %v70_v11  ;;  %v1698_v16 = vpack.c.bf16 %v73_v15, %v72_v14  ;;  %v74_v17 = vld [vmem:[#allocation6 + $0x50] sm:$0xff]  ;;  %v75_v18 = vld [vmem:[#allocation6 + $0x58] sm:$0xff]  ;;  %v76_v20 = vld [vmem:[#allocation6 + $0x60] sm:$0xff]  ;;  %p1565_p10 = scmp.ne.s32.totalorder %s777_s29, %s1564_s30  ;;  %p1570_p12 = scmp.lt.s32.totalorder %s1564_s30, %s1564_s30 }
  0x3c   :  { %1258 = vmatprep.subr.bf16.mxu0 %v1599_v0  ;;  %1282 = vmatprep.subr.bf16.mxu1 %v1599_v0  ;;  %v1704_v19 = vpack.c.bf16 %v75_v18, %v74_v17  ;;  %v77_v21 = vld [vmem:[#allocation6 + $0x68] sm:$0xff]  ;;  %v78_v23 = vld [vmem:[#allocation6 + $0x70] sm:$0xff]  ;;  %v79_v24 = vld [vmem:[#allocation6 + $0x78] sm:$0xff] }
  0x3d   :  { %v1710_v22 = vpack.c.bf16 %v77_v21, %v76_v20  ;;  %v1716_v25 = vpack.c.bf16 %v79_v24, %v78_v23  ;;  %v81_v27 = vld [vmem:[#allocation3] sm:$0x3]  ;;  %v155_v32 = vld [vmem:[#allocation3 + $0x2] sm:$0x3]  ;;  %v229_v37 = vld [vmem:[#allocation3 + $0x4] sm:$0x3]  ;;  %p1571_p13 = por %p1570_p12, %p1569_p11 }
  0x3e   :  { %v303_v42 = vld [vmem:[#allocation3 + $0x6] sm:$0x3]  ;;  %v377_v47 = vld [vmem:[#allocation3 + $0x8] sm:$0x3]  ;;  %v451_v52 = vld [vmem:[#allocation3 + $0xa] sm:$0x3] }
  0x3f   :  { %1260 = vmatpush3.bf16.msra.mxu0 %v1680_v7  ;;  %1284 = vmatpush3.bf16.msra.mxu1 %v1680_v7  ;;  %v80_v26 = vld [vmem:[#allocation2] sm:$0x3]  ;;  %v676_v57 = vld [vmem:[#allocation8] sm:$0xff]  ;;  %v678_v59 = vld [vmem:[#allocation8 + $0x10] sm:$0xff]  ;;  %p1572_p0 = pnand %p1571_p13, %p1565_p10 }
  0x40   :  { %1261 = vmatprep.subr.bf16.mxu0 %v1599_v0  ;;  %1285 = vmatprep.subr.bf16.mxu1 %v1599_v0  ;;  %v677_v58 = vld [vmem:[#allocation8 + $0x8] sm:$0xff]  ;;  %v679_v61 = vld [vmem:[#allocation8 + $0x18] sm:$0xff]  ;;  %v680_v63 = vld [vmem:[#allocation8 + $0x20] sm:$0xff] }
  0x41   :  { %v1448_v60 = vpack.c.bf16 %v677_v58, %v676_v57  ;;  %v1451_v62 = vpack.c.bf16 %v679_v61, %v678_v59  ;;  %v681_v2 = vld [vmem:[#allocation8 + $0x28] sm:$0xff]  ;;  %v682_v4 = vld [vmem:[#allocation8 + $0x30] sm:$0xff]  ;;  %v525_v9 = vld [vmem:[#allocation3 + $0xc] sm:$0x3] }
  0x42   :  { %v1454_v3 = vpack.c.bf16 %v681_v2, %v680_v63  ;;  %v686_v14 = vld [vmem:[#allocation8 + $0x50] sm:$0xff]  ;;  %v687_v15 = vld [vmem:[#allocation8 + $0x58] sm:$0xff]  ;;  %v688_v17 = vld [vmem:[#allocation8 + $0x60] sm:$0xff] }
  0x43   :  { %1263 = vmatpush3.bf16.msra.mxu0 %v1686_v10  ;;  %1287 = vmatpush3.bf16.msra.mxu1 %v1686_v10  ;;  %v689_v18 = vld [vmem:[#allocation8 + $0x68] sm:$0xff]  ;;  %v690_v20 = vld [vmem:[#allocation8 + $0x70] sm:$0xff]  ;;  %v691_v21 = vld [vmem:[#allocation8 + $0x78] sm:$0xff] }
  0x44   :  { %1264 = vmatprep.subr.bf16.mxu0 %v1599_v0  ;;  %1288 = vmatprep.subr.bf16.mxu1 %v1599_v0  ;;  %v599_v23 = vld [vmem:[#allocation3 + $0xe] sm:$0x3] }
  0x47   :  { %1266 = vmatpush3.bf16.msra.mxu0 %v1692_v13  ;;  %1290 = vmatpush3.bf16.msra.mxu1 %v1692_v13 }
  0x48   :  { %1267 = vmatprep.subr.bf16.mxu0 %v1599_v0  ;;  %1291 = vmatprep.subr.bf16.mxu1 %v1599_v0 }
  0x4b   :  { %1269 = vmatpush3.bf16.msra.mxu0 %v1698_v16  ;;  %1293 = vmatpush3.bf16.msra.mxu1 %v1698_v16 }
  0x4c   :  { %1270 = vmatprep.subr.bf16.mxu0 %v1599_v0  ;;  %1294 = vmatprep.subr.bf16.mxu1 %v1599_v0 }
  0x4f   :  { %1272 = vmatpush3.bf16.msra.mxu0 %v1704_v19  ;;  %1296 = vmatpush3.bf16.msra.mxu1 %v1704_v19 }
  0x50   :  { %1273 = vmatprep.subr.bf16.mxu0 %v1599_v0  ;;  %1297 = vmatprep.subr.bf16.mxu1 %v1599_v0 }
  0x53   :  { %1275 = vmatpush3.bf16.msra.mxu0 %v1710_v22  ;;  %1299 = vmatpush3.bf16.msra.mxu1 %v1710_v22 }
  0x54   :  { %1276 = vmatprep.subr.bf16.mxu0 %v1599_v0  ;;  %1300 = vmatprep.subr.bf16.mxu1 %v1599_v0 }
  0x57   :  { %1278 = vmatpush3.bf16.msra.mxu0 %v1716_v25  ;;  %1302 = vmatpush3.bf16.msra.mxu1 %v1716_v25 }
  0x58   :  { %1303 = vmatprep.subr.bf16.mxu0 %v1599_v0  ;;  %1327 = vmatprep.subr.bf16.mxu1 %v1599_v0 }
  0x5a   :  { %973 = vmatmul.mubr.f32.vlgmr.msra.gmra.mrb[0].mxu0 %v80_v26 }
  0x5b   :  { %1305 = vmatpush3.bf16.msra.mxu0 %v1677_v5  ;;  %1042 = vmatprep.mubr.msk.f32.mxu0 %vm1600_vm0, %v1601_v1 }
  0x5c   :  { %1306 = vmatprep.subr.bf16.mxu0 %v1599_v0 }
  0x5f   :  { %1308 = vmatpush3.bf16.msra.mxu0 %v1680_v7 }
  0x60   :  { %1309 = vmatprep.subr.bf16.mxu0 %v1599_v0 }
  0x63   :  { %1311 = vmatpush3.bf16.msra.mxu0 %v1686_v10 }
  0x64   :  { %1312 = vmatprep.subr.bf16.mxu0 %v1599_v0 }
  0x67   :  { %1314 = vmatpush3.bf16.msra.mxu0 %v1692_v13 }
  0x68   :  { %1315 = vmatprep.subr.bf16.mxu0 %v1599_v0 }
  0x6b   :  { %1317 = vmatpush3.bf16.msra.mxu0 %v1698_v16 }
  0x6c   :  { %1318 = vmatprep.subr.bf16.mxu0 %v1599_v0 }
  0x6f   :  { %1320 = vmatpush3.bf16.msra.mxu0 %v1704_v19 }
  0x70   :  { %1321 = vmatprep.subr.bf16.mxu0 %v1599_v0 }
  0x73   :  { %1323 = vmatpush3.bf16.msra.mxu0 %v1710_v22 }
  0x74   :  { %1324 = vmatprep.subr.bf16.mxu0 %v1599_v0 }
  0x77   :  { %1326 = vmatpush3.bf16.msra.mxu0 %v1716_v25 }
  0x78   :  { %1351 = vmatprep.subr.bf16.mxu0 %v1599_v0 }
 0x12d   :  { %v148_v28 = vpop.f32.mrb[0].mxu0 }
 0x12e   :  { %v152_v29 = vadd.f32 %v148_v28, %v81_v27  ;;  %v974_v30 = vpop.f32.mrb[1].mxu0  ;;  %v786_v28 = vld [vmem:[%s1859_s3] ss:$0 sm:$0xff] }
 0x130   :  { %1482 = vtanh.f32 %v152_v29 }
 0x13a   :  { %v1483_v31 = vpop.eup %1482 }
 0x13b   :  { %1008 = vmatmul.mubr.f32.vlgmr.msra.gmra.mrb[0].mxu1 %v1483_v31 }
 0x13c   :  { %1329 = vmatpush3.bf16.msra.mxu1 %v1677_v5  ;;  %1077 = vmatprep.mubr.msk.f32.mxu1 %vm1600_vm0, %v1601_v1 }
 0x13d   :  { %1330 = vmatprep.subr.bf16.mxu1 %v1599_v0 }
 0x140   :  { %1332 = vmatpush3.bf16.msra.mxu1 %v1680_v7 }
 0x141   :  { %1333 = vmatprep.subr.bf16.mxu1 %v1599_v0 }
 0x144   :  { %1335 = vmatpush3.bf16.msra.mxu1 %v1686_v10 }
 0x145   :  { %1336 = vmatprep.subr.bf16.mxu1 %v1599_v0 }
 0x148   :  { %1338 = vmatpush3.bf16.msra.mxu1 %v1692_v13 }
 0x149   :  { %1339 = vmatprep.subr.bf16.mxu1 %v1599_v0 }
 0x14c   :  { %1341 = vmatpush3.bf16.msra.mxu1 %v1698_v16 }
 0x14d   :  { %1342 = vmatprep.subr.bf16.mxu1 %v1599_v0 }
 0x150   :  { %1344 = vmatpush3.bf16.msra.mxu1 %v1704_v19 }
 0x151   :  { %1345 = vmatprep.subr.bf16.mxu1 %v1599_v0 }
 0x154   :  { %1347 = vmatpush3.bf16.msra.mxu1 %v1710_v22 }
 0x155   :  { %1348 = vmatprep.subr.bf16.mxu1 %v1599_v0 }
 0x158   :  { %1350 = vmatpush3.bf16.msra.mxu1 %v1716_v25 }
 0x159   :  { %1375 = vmatprep.subr.bf16.mxu1 %v1599_v0 }
 0x20e   :  { %v222_v33 = vpop.f32.mrb[0].mxu1 }
 0x20f   :  { %v226_v34 = vadd.f32 %v222_v33, %v155_v32  ;;  %v1009_v35 = vpop.f32.mrb[1].mxu1 }
 0x211   :  { %1484 = vtanh.f32 %v226_v34 }
 0x21b   :  { %v1485_v36 = vpop.eup %1484 }
 0x21c   :  { %1043 = vmatmul.mubr.f32.vlgmr.msra.gmra.mrb[2].mxu0 %v1485_v36 }
 0x21d   :  { %1353 = vmatpush3.bf16.msra.mxu0 %v1677_v5  ;;  %1112 = vmatprep.mubr.msk.f32.mxu0 %vm1600_vm0, %v1601_v1 }
 0x21e   :  { %1354 = vmatprep.subr.bf16.mxu0 %v1599_v0 }
 0x221   :  { %1356 = vmatpush3.bf16.msra.mxu0 %v1680_v7 }
 0x222   :  { %1357 = vmatprep.subr.bf16.mxu0 %v1599_v0 }
 0x225   :  { %1359 = vmatpush3.bf16.msra.mxu0 %v1686_v10 }
 0x226   :  { %1360 = vmatprep.subr.bf16.mxu0 %v1599_v0 }
 0x229   :  { %1362 = vmatpush3.bf16.msra.mxu0 %v1692_v13 }
 0x22a   :  { %1363 = vmatprep.subr.bf16.mxu0 %v1599_v0 }
 0x22d   :  { %1365 = vmatpush3.bf16.msra.mxu0 %v1698_v16 }
 0x22e   :  { %1366 = vmatprep.subr.bf16.mxu0 %v1599_v0 }
 0x231   :  { %1368 = vmatpush3.bf16.msra.mxu0 %v1704_v19 }
 0x232   :  { %1369 = vmatprep.subr.bf16.mxu0 %v1599_v0 }
 0x235   :  { %1371 = vmatpush3.bf16.msra.mxu0 %v1710_v22 }
 0x236   :  { %1372 = vmatprep.subr.bf16.mxu0 %v1599_v0 }
 0x239   :  { %1374 = vmatpush3.bf16.msra.mxu0 %v1716_v25 }
 0x23a   :  { %1399 = vmatprep.subr.bf16.mxu0 %v1599_v0 }
 0x2ef   :  { %v296_v38 = vpop.f32.mrb[2].mxu0 }
 0x2f0   :  { %v300_v39 = vadd.f32 %v296_v38, %v229_v37  ;;  %v1044_v40 = vpop.f32.mrb[3].mxu0 }
 0x2f2   :  { %1486 = vtanh.f32 %v300_v39 }
 0x2fc   :  { %v1487_v41 = vpop.eup %1486 }
 0x2fd   :  { %1078 = vmatmul.mubr.f32.vlgmr.msra.gmra.mrb[2].mxu1 %v1487_v41 }
 0x2fe   :  { %1377 = vmatpush3.bf16.msra.mxu1 %v1677_v5  ;;  %1147 = vmatprep.mubr.msk.f32.mxu1 %vm1600_vm0, %v1601_v1 }
 0x2ff   :  { %1378 = vmatprep.subr.bf16.mxu1 %v1599_v0 }
 0x302   :  { %1380 = vmatpush3.bf16.msra.mxu1 %v1680_v7 }
 0x303   :  { %1381 = vmatprep.subr.bf16.mxu1 %v1599_v0 }
 0x306   :  { %1383 = vmatpush3.bf16.msra.mxu1 %v1686_v10 }
 0x307   :  { %1384 = vmatprep.subr.bf16.mxu1 %v1599_v0 }
 0x30a   :  { %1386 = vmatpush3.bf16.msra.mxu1 %v1692_v13 }
 0x30b   :  { %1387 = vmatprep.subr.bf16.mxu1 %v1599_v0 }
 0x30e   :  { %1389 = vmatpush3.bf16.msra.mxu1 %v1698_v16 }
 0x30f   :  { %1390 = vmatprep.subr.bf16.mxu1 %v1599_v0 }
 0x312   :  { %1392 = vmatpush3.bf16.msra.mxu1 %v1704_v19 }
 0x313   :  { %1393 = vmatprep.subr.bf16.mxu1 %v1599_v0 }
 0x316   :  { %1395 = vmatpush3.bf16.msra.mxu1 %v1710_v22 }
 0x317   :  { %1396 = vmatprep.subr.bf16.mxu1 %v1599_v0 }
 0x31a   :  { %1398 = vmatpush3.bf16.msra.mxu1 %v1716_v25 }
 0x31b   :  { %1423 = vmatprep.subr.bf16.mxu1 %v1599_v0 }
 0x3d0   :  { %v370_v43 = vpop.f32.mrb[2].mxu1 }
 0x3d1   :  { %v374_v44 = vadd.f32 %v370_v43, %v303_v42  ;;  %v1079_v45 = vpop.f32.mrb[3].mxu1 }
 0x3d3   :  { %1488 = vtanh.f32 %v374_v44 }
 0x3dd   :  { %v1489_v46 = vpop.eup %1488 }
 0x3de   :  { %1113 = vmatmul.mubr.f32.vlgmr.msra.gmra.mrb[4].mxu0 %v1489_v46 }
 0x3df   :  { %1401 = vmatpush3.bf16.msra.mxu0 %v1677_v5  ;;  %1182 = vmatprep.mubr.msk.f32.mxu0 %vm1600_vm0, %v1601_v1 }
 0x3e0   :  { %1402 = vmatprep.subr.bf16.mxu0 %v1599_v0 }
 0x3e3   :  { %1404 = vmatpush3.bf16.msra.mxu0 %v1680_v7 }
 0x3e4   :  { %1405 = vmatprep.subr.bf16.mxu0 %v1599_v0 }
 0x3e7   :  { %1407 = vmatpush3.bf16.msra.mxu0 %v1686_v10 }
 0x3e8   :  { %1408 = vmatprep.subr.bf16.mxu0 %v1599_v0 }
 0x3eb   :  { %1410 = vmatpush3.bf16.msra.mxu0 %v1692_v13 }
 0x3ec   :  { %1411 = vmatprep.subr.bf16.mxu0 %v1599_v0 }
 0x3ef   :  { %1413 = vmatpush3.bf16.msra.mxu0 %v1698_v16 }
 0x3f0   :  { %1414 = vmatprep.subr.bf16.mxu0 %v1599_v0 }
 0x3f3   :  { %1416 = vmatpush3.bf16.msra.mxu0 %v1704_v19 }
 0x3f4   :  { %1417 = vmatprep.subr.bf16.mxu0 %v1599_v0 }
 0x3f7   :  { %1419 = vmatpush3.bf16.msra.mxu0 %v1710_v22 }
 0x3f8   :  { %1420 = vmatprep.subr.bf16.mxu0 %v1599_v0 }
 0x3fb   :  { %1422 = vmatpush3.bf16.msra.mxu0 %v1716_v25 }
 0x3fc   :  { %1447 = vmatprep.subr.bf16.mxu0 %v1599_v0 }
 0x4b1   :  { %v444_v48 = vpop.f32.mrb[4].mxu0 }
 0x4b2   :  { %v448_v49 = vadd.f32 %v444_v48, %v377_v47  ;;  %v1114_v50 = vpop.f32.mrb[5].mxu0 }
 0x4b4   :  { %1490 = vtanh.f32 %v448_v49 }
 0x4be   :  { %v1491_v51 = vpop.eup %1490 }
 0x4bf   :  { %1148 = vmatmul.mubr.f32.vlgmr.msra.gmra.mrb[4].mxu1 %v1491_v51 }
 0x4c0   :  { %1425 = vmatpush3.bf16.msra.mxu1 %v1677_v5  ;;  %1217 = vmatprep.mubr.msk.f32.mxu1 %vm1600_vm0, %v1601_v1  ;;  %v683_v5 = vld [vmem:[#allocation8 + $0x38] sm:$0xff] }
 0x4c1   :  { %1426 = vmatprep.subr.bf16.mxu1 %v1599_v0  ;;  %v1457_v6 = vpack.c.bf16 %v683_v5, %v682_v4 }
 0x4c4   :  { %1428 = vmatpush3.bf16.msra.mxu1 %v1680_v7  ;;  %v685_v7 = vld [vmem:[#allocation8 + $0x48] sm:$0xff] }
 0x4c5   :  { %1429 = vmatprep.subr.bf16.mxu1 %v1599_v0 }
 0x4c8   :  { %1431 = vmatpush3.bf16.msra.mxu1 %v1686_v10 }
 0x4c9   :  { %1432 = vmatprep.subr.bf16.mxu1 %v1599_v0 }
 0x4cc   :  { %1434 = vmatpush3.bf16.msra.mxu1 %v1692_v13 }
 0x4cd   :  { %1435 = vmatprep.subr.bf16.mxu1 %v1599_v0 }
 0x4d0   :  { %1437 = vmatpush3.bf16.msra.mxu1 %v1698_v16  ;;  %v1463_v16 = vpack.c.bf16 %v687_v15, %v686_v14 }
 0x4d1   :  { %1438 = vmatprep.subr.bf16.mxu1 %v1599_v0 }
 0x4d4   :  { %1440 = vmatpush3.bf16.msra.mxu1 %v1704_v19  ;;  %v1466_v19 = vpack.c.bf16 %v689_v18, %v688_v17 }
 0x4d5   :  { %1441 = vmatprep.subr.bf16.mxu1 %v1599_v0 }
 0x4d8   :  { %1443 = vmatpush3.bf16.msra.mxu1 %v1710_v22  ;;  %v1469_v22 = vpack.c.bf16 %v691_v21, %v690_v20 }
 0x4d9   :  { %1444 = vmatprep.subr.bf16.mxu1 %v1599_v0 }
 0x4dc   :  { %1446 = vmatpush3.bf16.msra.mxu1 %v1716_v25 }
 0x592   :  { %v518_v53 = vpop.f32.mrb[4].mxu1 }
 0x593   :  { %v522_v54 = vadd.f32 %v518_v53, %v451_v52  ;;  %v1149_v55 = vpop.f32.mrb[5].mxu1 }
 0x595   :  { %1492 = vtanh.f32 %v522_v54 }
 0x59f   :  { %v1493_v56 = vpop.eup %1492 }
 0x5a0   :  { %1183 = vmatmul.mubr.f32.vlgmr.msra.gmra.mrb[6].mxu0 %v1493_v56 }
 0x5a1   :  { %1252 = vmatprep.mubr.msk.f32.mxu0 %vm1600_vm0, %v1601_v1  ;;  %1449 = vmatpush3.bf16.msra.mxu0 %v1448_v60  ;;  %v684_v1 = vld [vmem:[#allocation8 + $0x40] sm:$0xff] }
 0x5a2   :  { %1450 = vmatprep.subr.bf16.mxu0 %v1599_v0  ;;  %v1460_v8 = vpack.c.bf16 %v685_v7, %v684_v1 }
 0x5a5   :  { %1452 = vmatpush3.bf16.msra.mxu0 %v1451_v62 }
 0x5a6   :  { %1453 = vmatprep.subr.bf16.mxu0 %v1599_v0 }
 0x5a9   :  { %1455 = vmatpush3.bf16.msra.mxu0 %v1454_v3 }
 0x5aa   :  { %1456 = vmatprep.subr.bf16.mxu0 %v1599_v0 }
 0x5ad   :  { %1458 = vmatpush3.bf16.msra.mxu0 %v1457_v6 }
 0x5ae   :  { %1459 = vmatprep.subr.bf16.mxu0 %v1599_v0 }
 0x5b1   :  { %1461 = vmatpush3.bf16.msra.mxu0 %v1460_v8 }
 0x5b2   :  { %1462 = vmatprep.subr.bf16.mxu0 %v1599_v0 }
 0x5b5   :  { %1464 = vmatpush3.bf16.msra.mxu0 %v1463_v16 }
 0x5b6   :  { %1465 = vmatprep.subr.bf16.mxu0 %v1599_v0 }
 0x5b9   :  { %1467 = vmatpush3.bf16.msra.mxu0 %v1466_v19 }
 0x5ba   :  { %1468 = vmatprep.subr.bf16.mxu0 %v1599_v0 }
 0x5bd   :  { %1470 = vmatpush3.bf16.msra.mxu0 %v1469_v22 }
 0x673   :  { %v592_v10 = vpop.f32.mrb[6].mxu0 }
 0x674   :  { %v596_v11 = vadd.f32 %v592_v10, %v525_v9  ;;  %v1184_v12 = vpop.f32.mrb[7].mxu0 }
 0x676   :  { %1494 = vtanh.f32 %v596_v11 }
 0x680   :  { %v1495_v13 = vpop.eup %1494 }
 0x681   :  { %1218 = vmatmul.mubr.f32.vlgmr.msra.gmra.mrb[6].mxu1 %v1495_v13 }
 0x754   :  { %v666_v24 = vpop.f32.mrb[6].mxu1 }
 0x755   :  { %v670_v25 = vadd.f32 %v666_v24, %v599_v23  ;;  %v1219_v26 = vpop.f32.mrb[7].mxu1 }
 0x757   :  { %1496 = vtanh.f32 %v670_v25 }
 0x761   :  { %v1497_v27 = vpop.eup %1496 }
 0x762   :  { %672 = vst [vmem:[#allocation2] sm:$0x3] %v1497_v27  ;;  %1253 = vmatmul.mubr.f32.vlgmr.msra.gmra.mrb[8].mxu0 %v1497_v27 }
 0x835   :  { %v765_v29 = vpop.f32.mrb[8].mxu0 }
 0x836   :  { %v766_v0 = vadd.f32 %v786_v28, %v765_v29  ;;  %v1254_v30 = vpop.f32.mrb[9].mxu0 }
 0x838   :  { %769 = vst [vmem:[#allocation9] sm:$0x3] %v766_v0 }
 0x839   :  { %1575 = shalt.err (!%p1572_p0)
}
 0x83a   :  { %s1576_s7 = scalar_lea.hbm %s1860_s4, 32 }
 0x83b   :  { %p1577_p1 = scmp.ne.s32.totalorder %s1860_s4, %s1576_s7  ;;  %p1580_p2 = scmp.lt.u32.totalorder %s1576_s7, %s1860_s4 }
 0x83d   :  { %p1582_p3 = pnand %p1580_p2, %p1577_p1 }
 0x83f   :  { %1585 = shalt.err (!%p1582_p3)
}
 0x840   :  { %779 = dma.vmem_to_hbm [thread:$0]  %s777_s29, 32, %s1860_s4, [#allocation5]  }
 0x841   :  { %1590 = dma.done.wait [#allocation5], 32  }
 0x842   :  { %1591 = vsyncadd [#allocation5], 4294967264 }
 0x843   :  { %783 = vsyncpa [#allocation4], 1 }
 0x844   :  { %784 = vsyncpa [#allocation7], 1 }
 0x845   :  { %785 = vsyncpa [#allocation5], 1 }

</bundles_post_ra>
